<compile_context>
chip_gen: v6e
topology: v6e:2x2x1
jax: 0.10.0
libtpu: 0.0.40
codegen_flags: <defaults>
</compile_context>

<pallas_src>
import jax
import jax.numpy as jnp
from jax.experimental import pallas as pl
from jax.experimental.pallas import tpu as pltpu

# ----------------------------- problem sizes (small, synthetic) -----------------------------
N_POINTS = 64            # total number of points across the batch
C_FEAT   = 13            # per-point feature channels (x)
C_POS    = 3             # xyz coordinates (pos)
C_IN     = C_FEAT + C_POS
HIDDEN   = (32, 64, 128) # small analog of MLP([C_in, 256, 512, 1024]) in FSCT
N_BATCH  = 2             # number of point clouds in the batch
BN_EPS   = 1e-5
TILE_M   = 16            # point-tile rows (toy size; use 512-2048 at FSCT scale)
LANE_PAD = 128           # pad hidden channels to lane width


# ----------------------------------------- kernel ------------------------------------------
def global_sa_kernel(seg_start_blocks_ref,        # SMEM scalar-prefetch: [B] segment start blocks
                     x_ref, pos_ref,              # [TM, C_feat], [TM, 3] point tiles (f32)
                     w1x_ref, w1p_ref, b1_ref,    # layer 1 (rows split x|pos), bf16 W / f32 bias
                     w2_ref, b2_ref,              # layer 2 (BN1 folded into W/b), bf16 / f32
                     w3_ref, b3_ref,              # layer 3 (BN2 folded into W/b), bf16 / f32
                     s3_ref, t3_ref,              # layer-3 BN (eval) scale / shift, f32
                     out_ref):                    # [1, 1, H] running segment max (f32)
    del seg_start_blocks_ref                      # consumed by the index_maps only
    t = pl.program_id(1)

    # ---- fused MLP on this point tile: bf16 MXU matmuls, f32 accumulation & elementwise ----
    xb = x_ref[...].astype(jnp.bfloat16)
    pb = pos_ref[...].astype(jnp.bfloat16)
    z1 = (jnp.dot(xb, w1x_ref[...], preferred_element_type=jnp.float32)
          + jnp.dot(pb, w1p_ref[...], preferred_element_type=jnp.float32)
          + b1_ref[...])
    h1 = jnp.maximum(z1, 0.0)

    z2 = jnp.dot(h1.astype(jnp.bfloat16), w2_ref[...],
                 preferred_element_type=jnp.float32) + b2_ref[...]
    h2 = jnp.maximum(z2, 0.0)

    z3 = jnp.dot(h2.astype(jnp.bfloat16), w3_ref[...],
                 preferred_element_type=jnp.float32) + b3_ref[...]
    h3 = jnp.maximum(z3, 0.0) * s3_ref[...] + t3_ref[...]   # only last BN kept explicit

    # ---- one-pass segment max: fold this tile into the resident per-batch accumulator ----
    tile_max = jnp.max(h3, axis=0, keepdims=True)[None]      # [1, 1, H]

    @pl.when(t == 0)
    def _init():
        out_ref[...] = tile_max

    @pl.when(t != 0)
    def _accum():
        out_ref[...] = jnp.maximum(out_ref[...], tile_max)


# ----------------------------- one-time parameter preparation ------------------------------
def prepare_params(params, pad_to=LANE_PAD):
    """Fold eval-mode BN, split W1 by (x|pos) rows, zero-pad lanes, cast matmul weights to bf16."""
    (w1, b1, g1, be1, m1, v1) = params[0]
    (w2, b2, g2, be2, m2, v2) = params[1]
    (w3, b3, g3, be3, m3, v3) = params[2]

    s1 = g1 / jnp.sqrt(v1 + BN_EPS); t1 = be1 - m1 * s1
    s2 = g2 / jnp.sqrt(v2 + BN_EPS); t2 = be2 - m2 * s2
    s3 = g3 / jnp.sqrt(v3 + BN_EPS); t3 = be3 - m3 * s3

    # Fold BN1 into layer-2 weights/bias, BN2 into layer-3 weights/bias (affine, eval mode).
    w2f = s1[:, None] * w2
    b2f = t1 @ w2 + b2
    w3f = s2[:, None] * w3
    b3f = t2 @ w3 + b3

    # Split layer-1 weights so the kernel never needs the [N, C_in] concat.
    w1x, w1p = w1[:C_FEAT, :], w1[C_FEAT:, :]

    H1, H2, H3 = w1.shape[1], w2.shape[1], w3.shape[1]
    H1p, H2p = max(H1, pad_to), max(H2, pad_to)
    assert H3 % 128 == 0, "final hidden width must be lane-dense (multiple of 128)"

    pad_c = lambda a, n: jnp.pad(a, ((0, 0), (0, n - a.shape[1])))
    pad_r = lambda a, n: jnp.pad(a, ((0, n - a.shape[0]), (0, 0)))
    row = lambda a: a.reshape(1, -1).astype(jnp.float32)

    w1x = pad_c(w1x, H1p).astype(jnp.bfloat16)
    w1p = pad_c(w1p, H1p).astype(jnp.bfloat16)
    b1v = row(jnp.pad(b1, (0, H1p - H1)))

    w2f = pad_c(pad_r(w2f, H1p), H2p).astype(jnp.bfloat16)
    b2v = row(jnp.pad(b2f, (0, H2p - H2)))

    w3f = pad_r(w3f, H2p).astype(jnp.bfloat16)
    b3v, s3v, t3v = row(b3f), row(s3), row(t3)

    return (w1x, w1p, b1v, w2f, b2v, w3f, b3v, s3v, t3v)


# -------------------------------------- module wrapper -------------------------------------
def global_sa_module(x, pos, batch, params, *, num_batches=N_BATCH, tile_m=TILE_M):
    """x: [N, C_feat] f32, pos: [N, 3] f32, batch: [N] int32 sorted (values in [0, B))."""
    prepared = prepare_params(params)
    w1x, w1p, b1v, w2f, b2v, w3f, b3v, s3v, t3v = prepared
    h_out = w3f.shape[1]

    n = x.shape[0]
    seg_len = n // num_batches
    # TODO(synk): ragged / non-tile-aligned segments would need a prefetched segment-end table
    # and per-row masking before the max; the toy input (equal-sized segments) doesn't.
    assert n % num_batches == 0 and seg_len % tile_m == 0, "segments must be tile-aligned"
    tiles_per_seg = seg_len // tile_m

    # Per-segment start offsets (in block units) -> SMEM scalar prefetch for the index_maps.
    seg_starts = jnp.searchsorted(batch, jnp.arange(num_batches, dtype=batch.dtype))
    seg_start_blocks = (seg_starts // tile_m).astype(jnp.int32)

    pt_map = lambda b, t, sb: (sb[b] + t, 0)       # point tile of segment b, tile t
    w_map = lambda b, t, sb: (0, 0)                # weights: constant block -> VMEM resident

    weight_args = (w1x, w1p, b1v, w2f, b2v, w3f, b3v, s3v, t3v)
    grid_spec = pltpu.PrefetchScalarGridSpec(
        num_scalar_prefetch=1,
        grid=(num_batches, tiles_per_seg),
        in_specs=[pl.BlockSpec((tile_m, x.shape[1]), pt_map),
                  pl.BlockSpec((tile_m, pos.shape[1]), pt_map)]
                 + [pl.BlockSpec(w.shape, w_map) for w in weight_args],
        out_specs=pl.BlockSpec((1, 1, h_out), lambda b, t, sb: (b, 0, 0)),
    )

    pooled = pl.pallas_call(
        global_sa_kernel,
        out_shape=jax.ShapeDtypeStruct((num_batches, 1, h_out), jnp.float32),
        grid_spec=grid_spec,
        compiler_params=pltpu.CompilerParams(
            # batch/segment axis shards across TensorCores; tile axis is the reduction.
            dimension_semantics=("parallel", "arbitrary"),
            # At FSCT scale add vmem_limit_bytes=... here (v7x: 64 MiB physical VMEM).
        ),
    )(seg_start_blocks, x.astype(jnp.float32), pos.astype(jnp.float32), *weight_args)

    pooled = pooled.reshape(num_batches, h_out)
    pos_out = jnp.zeros((num_batches, 3), dtype=pos.dtype)
    batch_out = jnp.arange(num_batches, dtype=jnp.int32)
    return pooled, pos_out, batch_out


# ------------------------------------- references ------------------------------------------
def reference_f32(x, pos, batch, params, num_batches):
    """Original-module semantics, all f32."""
    h = jnp.concatenate([x, pos], axis=1).astype(jnp.float32)
    for (w, b, gamma, beta, mean, var) in params:
        h = h @ w + b
        h = jnp.maximum(h, 0.0)
        h = gamma * (h - mean) / jnp.sqrt(var + BN_EPS) + beta
    one_hot = batch[:, None] == jnp.arange(num_batches)[None, :]
    masked = jnp.where(one_hot.T[:, :, None], h[None], -jnp.inf)
    return jnp.max(masked, axis=1)


def reference_mirrored(x, pos, batch, prepared, num_batches):
    """Same numerics as the kernel (folded BN, bf16 matmul operands, f32 accumulation)."""
    w1x, w1p, b1v, w2f, b2v, w3f, b3v, s3v, t3v = prepared
    xb, pb = x.astype(jnp.bfloat16), pos.astype(jnp.bfloat16)
    z1 = (jnp.dot(xb, w1x, preferred_element_type=jnp.float32)
          + jnp.dot(pb, w1p, preferred_element_type=jnp.float32) + b1v)
    h1 = jnp.maximum(z1, 0.0)
    z2 = jnp.dot(h1.astype(jnp.bfloat16), w2f, preferred_element_type=jnp.float32) + b2v
    h2 = jnp.maximum(z2, 0.0)
    z3 = jnp.dot(h2.astype(jnp.bfloat16), w3f, preferred_element_type=jnp.float32) + b3v
    h3 = jnp.maximum(z3, 0.0) * s3v + t3v
    one_hot = batch[:, None] == jnp.arange(num_batches)[None, :]
    masked = jnp.where(one_hot.T[:, :, None], h3[None], -jnp.inf)
    return jnp.max(masked, axis=1)


# ------------------------------------------- main ------------------------------------------
if __name__ == "__main__":
    key = jax.random.PRNGKey(0)
    kx, kp, *kw = jax.random.split(key, 2 + 3 * 4)

    x = jax.random.normal(kx, (N_POINTS, C_FEAT), dtype=jnp.float32)
    pos = jax.random.normal(kp, (N_POINTS, C_POS), dtype=jnp.float32)
    batch = jnp.repeat(jnp.arange(N_BATCH, dtype=jnp.int32), N_POINTS // N_BATCH)

    # Deterministic parameters for NN = MLP([C_in, 32, 64, 128]) with Lin->ReLU->BN layers.
    params = []
    dims = (C_IN,) + HIDDEN
    ki = 0
    for li in range(3):
        cin, cout = dims[li], dims[li + 1]
        w = jax.random.normal(kw[ki], (cin, cout), dtype=jnp.float32) * (1.0 / jnp.sqrt(cin)); ki += 1
        b = 0.1 * jax.random.normal(kw[ki], (cout,), dtype=jnp.float32); ki += 1
        gamma = 1.0 + 0.1 * jax.random.normal(kw[ki], (cout,), dtype=jnp.float32); ki += 1
        beta = 0.1 * jax.random.normal(kw[ki], (cout,), dtype=jnp.float32); ki += 1
        mean = jnp.zeros((cout,), jnp.float32)          # eval-mode running stats
        var = jnp.ones((cout,), jnp.float32)
        params.append((w, b, gamma, beta, mean, var))

    out_x, out_pos, out_batch = global_sa_module(x, pos, batch, params)
    out_x = jax.block_until_ready(out_x)
    jax.block_until_ready(out_pos)
    jax.block_until_ready(out_batch)

    assert out_x.shape == (N_BATCH, HIDDEN[-1])
    assert out_pos.shape == (N_BATCH, 3)
    assert out_batch.shape == (N_BATCH,)

    # Tight check vs a reference that mirrors the kernel's numerics (bf16 MXU, folded BN).
    ref_m = reference_mirrored(x, pos, batch, prepare_params(params), N_BATCH)
    assert jnp.allclose(out_x, ref_m, atol=5e-3, rtol=5e-3), "mismatch vs bf16-mirrored reference"

    # Loose sanity check vs the original full-f32 module semantics (bf16 rounding only).
    ref_f = reference_f32(x, pos, batch, params, N_BATCH)
    assert jnp.allclose(out_x, ref_f, atol=1.5e-1, rtol=1.5e-1), "mismatch vs f32 reference"

    print("KERNEL_OK")
</pallas_src>

<mosaic_0001>
module attributes {stable_mosaic.version = 11 : i64} {
  func.func @global_sa_kernel(%arg0: i32, %arg1: i32, %arg2: memref<2xi32, #tpu.memory_space<smem>>, %arg3: memref<16x13xf32, #tpu.memory_space<vmem>>, %arg4: memref<16x3xf32, #tpu.memory_space<vmem>>, %arg5: memref<13x128xbf16, #tpu.memory_space<vmem>>, %arg6: memref<3x128xbf16, #tpu.memory_space<vmem>>, %arg7: memref<1x128xf32, #tpu.memory_space<vmem>>, %arg8: memref<128x128xbf16, #tpu.memory_space<vmem>>, %arg9: memref<1x128xf32, #tpu.memory_space<vmem>>, %arg10: memref<128x128xbf16, #tpu.memory_space<vmem>>, %arg11: memref<1x128xf32, #tpu.memory_space<vmem>>, %arg12: memref<1x128xf32, #tpu.memory_space<vmem>>, %arg13: memref<1x128xf32, #tpu.memory_space<vmem>>, %arg14: memref<1x1x128xf32, #tpu.memory_space<vmem>>) attributes {dimension_semantics = [#tpu.dimension_semantics<parallel>, #tpu.dimension_semantics<arbitrary>], iteration_bounds = array<i64: 2, 2>, scalar_prefetch = 1 : i64, scratch_operands = 0 : i64, tpu.core_type = #tpu.core_type<tc>, window_params = [{transform_indices = @transform_0, window_bounds = array<i64: 16, 13>}, {transform_indices = @transform_1, window_bounds = array<i64: 16, 3>}, {pipeline_mode = #tpu.pipeline_mode<synchronous>, transform_indices = @transform_2, window_bounds = array<i64: 13, 128>}, {pipeline_mode = #tpu.pipeline_mode<synchronous>, transform_indices = @transform_3, window_bounds = array<i64: 3, 128>}, {pipeline_mode = #tpu.pipeline_mode<synchronous>, transform_indices = @transform_4, window_bounds = array<i64: 1, 128>}, {pipeline_mode = #tpu.pipeline_mode<synchronous>, transform_indices = @transform_5, window_bounds = array<i64: 128, 128>}, {pipeline_mode = #tpu.pipeline_mode<synchronous>, transform_indices = @transform_6, window_bounds = array<i64: 1, 128>}, {pipeline_mode = #tpu.pipeline_mode<synchronous>, transform_indices = @transform_7, window_bounds = array<i64: 128, 128>}, {pipeline_mode = #tpu.pipeline_mode<synchronous>, transform_indices = @transform_8, window_bounds = array<i64: 1, 128>}, {pipeline_mode = #tpu.pipeline_mode<synchronous>, transform_indices = @transform_9, window_bounds = array<i64: 1, 128>}, {pipeline_mode = #tpu.pipeline_mode<synchronous>, transform_indices = @transform_10, window_bounds = array<i64: 1, 128>}, {transform_indices = @transform_11, window_bounds = array<i64: 1, 1, 128>}]} {
    %c0 = arith.constant 0 : index
    %c0_0 = arith.constant 0 : index
    %0 = vector.load %arg3[%c0, %c0_0] : memref<16x13xf32, #tpu.memory_space<vmem>>, vector<16x13xf32>
    %1 = arith.truncf %0 : vector<16x13xf32> to vector<16x13xbf16>
    %c0_1 = arith.constant 0 : index
    %c0_2 = arith.constant 0 : index
    %2 = vector.load %arg4[%c0_1, %c0_2] : memref<16x3xf32, #tpu.memory_space<vmem>>, vector<16x3xf32>
    %3 = arith.truncf %2 : vector<16x3xf32> to vector<16x3xbf16>
    %c0_3 = arith.constant 0 : index
    %c0_4 = arith.constant 0 : index
    %4 = vector.load %arg5[%c0_3, %c0_4] : memref<13x128xbf16, #tpu.memory_space<vmem>>, vector<13x128xbf16>
    %cst = arith.constant dense<0.000000e+00> : vector<16x128xf32>
    %5 = tpu.matmul %1, %4, %cst {dimension_numbers = #tpu.dot_dimension_numbers<[1], [0], [0], [1], [0, 0, 1, 1], [], []>} : vector<16x13xbf16>, vector<13x128xbf16>, vector<16x128xf32> -> vector<16x128xf32>
    %c0_5 = arith.constant 0 : index
    %c0_6 = arith.constant 0 : index
    %6 = vector.load %arg6[%c0_5, %c0_6] : memref<3x128xbf16, #tpu.memory_space<vmem>>, vector<3x128xbf16>
    %cst_7 = arith.constant dense<0.000000e+00> : vector<16x128xf32>
    %7 = tpu.matmul %3, %6, %cst_7 {dimension_numbers = #tpu.dot_dimension_numbers<[1], [0], [0], [1], [0, 0, 1, 1], [], []>} : vector<16x3xbf16>, vector<3x128xbf16>, vector<16x128xf32> -> vector<16x128xf32>
    %8 = arith.addf %5, %7 : vector<16x128xf32>
    %c0_8 = arith.constant 0 : index
    %c0_9 = arith.constant 0 : index
    %9 = vector.load %arg7[%c0_8, %c0_9] : memref<1x128xf32, #tpu.memory_space<vmem>>, vector<1x128xf32>
    %10 = vector.broadcast %9 : vector<1x128xf32> to vector<16x128xf32>
    %11 = arith.addf %8, %10 : vector<16x128xf32>
    %cst_10 = arith.constant 0.000000e+00 : f32
    %12 = vector.broadcast %cst_10 : f32 to vector<16x128xf32>
    %13 = arith.maximumf %11, %12 : vector<16x128xf32>
    %14 = arith.truncf %13 : vector<16x128xf32> to vector<16x128xbf16>
    %c0_11 = arith.constant 0 : index
    %c0_12 = arith.constant 0 : index
    %15 = vector.load %arg8[%c0_11, %c0_12] : memref<128x128xbf16, #tpu.memory_space<vmem>>, vector<128x128xbf16>
    %cst_13 = arith.constant dense<0.000000e+00> : vector<16x128xf32>
    %16 = tpu.matmul %14, %15, %cst_13 {dimension_numbers = #tpu.dot_dimension_numbers<[1], [0], [0], [1], [0, 0, 1, 1], [], []>} : vector<16x128xbf16>, vector<128x128xbf16>, vector<16x128xf32> -> vector<16x128xf32>
    %c0_14 = arith.constant 0 : index
    %c0_15 = arith.constant 0 : index
    %17 = vector.load %arg9[%c0_14, %c0_15] : memref<1x128xf32, #tpu.memory_space<vmem>>, vector<1x128xf32>
    %18 = vector.broadcast %17 : vector<1x128xf32> to vector<16x128xf32>
    %19 = arith.addf %16, %18 : vector<16x128xf32>
    %cst_16 = arith.constant 0.000000e+00 : f32
    %20 = vector.broadcast %cst_16 : f32 to vector<16x128xf32>
    %21 = arith.maximumf %19, %20 : vector<16x128xf32>
    %22 = arith.truncf %21 : vector<16x128xf32> to vector<16x128xbf16>
    %c0_17 = arith.constant 0 : index
    %c0_18 = arith.constant 0 : index
    %23 = vector.load %arg10[%c0_17, %c0_18] : memref<128x128xbf16, #tpu.memory_space<vmem>>, vector<128x128xbf16>
    %cst_19 = arith.constant dense<0.000000e+00> : vector<16x128xf32>
    %24 = tpu.matmul %22, %23, %cst_19 {dimension_numbers = #tpu.dot_dimension_numbers<[1], [0], [0], [1], [0, 0, 1, 1], [], []>} : vector<16x128xbf16>, vector<128x128xbf16>, vector<16x128xf32> -> vector<16x128xf32>
    %c0_20 = arith.constant 0 : index
    %c0_21 = arith.constant 0 : index
    %25 = vector.load %arg11[%c0_20, %c0_21] : memref<1x128xf32, #tpu.memory_space<vmem>>, vector<1x128xf32>
    %26 = vector.broadcast %25 : vector<1x128xf32> to vector<16x128xf32>
    %27 = arith.addf %24, %26 : vector<16x128xf32>
    %cst_22 = arith.constant 0.000000e+00 : f32
    %28 = vector.broadcast %cst_22 : f32 to vector<16x128xf32>
    %29 = arith.maximumf %27, %28 : vector<16x128xf32>
    %c0_23 = arith.constant 0 : index
    %c0_24 = arith.constant 0 : index
    %30 = vector.load %arg12[%c0_23, %c0_24] : memref<1x128xf32, #tpu.memory_space<vmem>>, vector<1x128xf32>
    %31 = vector.broadcast %30 : vector<1x128xf32> to vector<16x128xf32>
    %32 = arith.mulf %29, %31 : vector<16x128xf32>
    %c0_25 = arith.constant 0 : index
    %c0_26 = arith.constant 0 : index
    %33 = vector.load %arg13[%c0_25, %c0_26] : memref<1x128xf32, #tpu.memory_space<vmem>>, vector<1x128xf32>
    %34 = vector.broadcast %33 : vector<1x128xf32> to vector<16x128xf32>
    %35 = arith.addf %32, %34 : vector<16x128xf32>
    %cst_27 = arith.constant dense<0xFF800000> : vector<128xf32>
    %36 = vector.multi_reduction <maximumf>, %35, %cst_27 [0] : vector<16x128xf32> to vector<128xf32>
    %37 = vector.shape_cast %36 : vector<128xf32> to vector<1x128xf32>
    %38 = vector.shape_cast %37 : vector<1x128xf32> to vector<1x1x128xf32>
    %c0_i32 = arith.constant 0 : i32
    %39 = arith.cmpi eq, %arg1, %c0_i32 : i32
    %40 = arith.extui %39 : i1 to i32
    %c0_i32_28 = arith.constant 0 : i32
    %41 = arith.cmpi ne, %40, %c0_i32_28 : i32
    scf.if %41 {
      %c0_31 = arith.constant 0 : index
      %c0_32 = arith.constant 0 : index
      %c0_33 = arith.constant 0 : index
      %45 = vector.load %arg14[%c0_31, %c0_32, %c0_33] : memref<1x1x128xf32, #tpu.memory_space<vmem>>, vector<1x1x128xf32>
      tpu.vector_store %arg14[%c0_31, %c0_32, %c0_33], %38 {strides = array<i32>} : memref<1x1x128xf32, #tpu.memory_space<vmem>>, vector<1x1x128xf32>,
    } else {
    }
    %c0_i32_29 = arith.constant 0 : i32
    %42 = arith.cmpi ne, %arg1, %c0_i32_29 : i32
    %43 = arith.extui %42 : i1 to i32
    %c0_i32_30 = arith.constant 0 : i32
    %44 = arith.cmpi ne, %43, %c0_i32_30 : i32
    scf.if %44 {
      %c0_31 = arith.constant 0 : index
      %c0_32 = arith.constant 0 : index
      %c0_33 = arith.constant 0 : index
      %45 = vector.load %arg14[%c0_31, %c0_32, %c0_33] : memref<1x1x128xf32, #tpu.memory_space<vmem>>, vector<1x1x128xf32>
      %46 = arith.maximumf %45, %38 : vector<1x1x128xf32>
      %c0_34 = arith.constant 0 : index
      %c0_35 = arith.constant 0 : index
      %c0_36 = arith.constant 0 : index
      %47 = vector.load %arg14[%c0_34, %c0_35, %c0_36] : memref<1x1x128xf32, #tpu.memory_space<vmem>>, vector<1x1x128xf32>
      tpu.vector_store %arg14[%c0_34, %c0_35, %c0_36], %46 {strides = array<i32>} : memref<1x1x128xf32, #tpu.memory_space<vmem>>, vector<1x1x128xf32>,
    } else {
    }
    return
  }
  func.func @transform_0(%arg0: i32, %arg1: i32, %arg2: memref<2xi32, #tpu.memory_space<smem>>) -> (i32, i32) {
    %0 = arith.index_cast %arg0 : i32 to index
    %1 = memref.load %arg2[%0] : memref<2xi32, #tpu.memory_space<smem>>
    %2 = arith.addi %1, %arg1 : i32
    %c0_i32 = arith.constant 0 : i32
    %c0_i32_0 = arith.constant 0 : i32
    return %2, %c0_i32 : i32, i32
  }
  func.func @transform_1(%arg0: i32, %arg1: i32, %arg2: memref<2xi32, #tpu.memory_space<smem>>) -> (i32, i32) {
    %0 = arith.index_cast %arg0 : i32 to index
    %1 = memref.load %arg2[%0] : memref<2xi32, #tpu.memory_space<smem>>
    %2 = arith.addi %1, %arg1 : i32
    %c0_i32 = arith.constant 0 : i32
    %c0_i32_0 = arith.constant 0 : i32
    return %2, %c0_i32 : i32, i32
  }
  func.func @transform_2(%arg0: i32, %arg1: i32, %arg2: memref<2xi32, #tpu.memory_space<smem>>) -> (i32, i32) {
    %c0_i32 = arith.constant 0 : i32
    %c0_i32_0 = arith.constant 0 : i32
    %c0_i32_1 = arith.constant 0 : i32
    return %c0_i32, %c0_i32_0 : i32, i32
  }
  func.func @transform_3(%arg0: i32, %arg1: i32, %arg2: memref<2xi32, #tpu.memory_space<smem>>) -> (i32, i32) {
    %c0_i32 = arith.constant 0 : i32
    %c0_i32_0 = arith.constant 0 : i32
    %c0_i32_1 = arith.constant 0 : i32
    return %c0_i32, %c0_i32_0 : i32, i32
  }
  func.func @transform_4(%arg0: i32, %arg1: i32, %arg2: memref<2xi32, #tpu.memory_space<smem>>) -> (i32, i32) {
    %c0_i32 = arith.constant 0 : i32
    %c0_i32_0 = arith.constant 0 : i32
    %c0_i32_1 = arith.constant 0 : i32
    return %c0_i32, %c0_i32_0 : i32, i32
  }
  func.func @transform_5(%arg0: i32, %arg1: i32, %arg2: memref<2xi32, #tpu.memory_space<smem>>) -> (i32, i32) {
    %c0_i32 = arith.constant 0 : i32
    %c0_i32_0 = arith.constant 0 : i32
    %c0_i32_1 = arith.constant 0 : i32
    return %c0_i32, %c0_i32_0 : i32, i32
  }
  func.func @transform_6(%arg0: i32, %arg1: i32, %arg2: memref<2xi32, #tpu.memory_space<smem>>) -> (i32, i32) {
    %c0_i32 = arith.constant 0 : i32
    %c0_i32_0 = arith.constant 0 : i32
    %c0_i32_1 = arith.constant 0 : i32
    return %c0_i32, %c0_i32_0 : i32, i32
  }
  func.func @transform_7(%arg0: i32, %arg1: i32, %arg2: memref<2xi32, #tpu.memory_space<smem>>) -> (i32, i32) {
    %c0_i32 = arith.constant 0 : i32
    %c0_i32_0 = arith.constant 0 : i32
    %c0_i32_1 = arith.constant 0 : i32
    return %c0_i32, %c0_i32_0 : i32, i32
  }
  func.func @transform_8(%arg0: i32, %arg1: i32, %arg2: memref<2xi32, #tpu.memory_space<smem>>) -> (i32, i32) {
    %c0_i32 = arith.constant 0 : i32
    %c0_i32_0 = arith.constant 0 : i32
    %c0_i32_1 = arith.constant 0 : i32
    return %c0_i32, %c0_i32_0 : i32, i32
  }
  func.func @transform_9(%arg0: i32, %arg1: i32, %arg2: memref<2xi32, #tpu.memory_space<smem>>) -> (i32, i32) {
    %c0_i32 = arith.constant 0 : i32
    %c0_i32_0 = arith.constant 0 : i32
    %c0_i32_1 = arith.constant 0 : i32
    return %c0_i32, %c0_i32_0 : i32, i32
  }
  func.func @transform_10(%arg0: i32, %arg1: i32, %arg2: memref<2xi32, #tpu.memory_space<smem>>) -> (i32, i32) {
    %c0_i32 = arith.constant 0 : i32
    %c0_i32_0 = arith.constant 0 : i32
    %c0_i32_1 = arith.constant 0 : i32
    return %c0_i32, %c0_i32_0 : i32, i32
  }
  func.func @transform_11(%arg0: i32, %arg1: i32, %arg2: memref<2xi32, #tpu.memory_space<smem>>) -> (i32, i32, i32) {
    %c0_i32 = arith.constant 0 : i32
    %c0_i32_0 = arith.constant 0 : i32
    %c0_i32_1 = arith.constant 0 : i32
    return %arg0, %c0_i32, %c0_i32_0 : i32, i32, i32
  }
}

</mosaic_0001>

<bundles_post_ra>
// kernel: tpu_custom_call.1
= control target key start
LH: loop header
LB: loop body
LE: loop exit
PB: predicated region body
PF: predicated region fallthrough
CT: control target
= control target key end

     0   :  { %s1553_s0 = inlined_call_operand.vmem [shape: s32[2], index: 0, kind: input, shape index: {}]   ;;  %s1554_s1 = inlined_call_operand.vmem [shape: f32[64,13], index: 1, kind: input, shape index: {}]   ;;  %s1555_s2 = inlined_call_operand.vmem [shape: f32[64,3], index: 2, kind: input, shape index: {}]   ;;  %s1556_s3 = inlined_call_operand.vmem [shape: bf16[13,128], index: 3, kind: input, shape index: {}]   ;;  %s1557_s4 = inlined_call_operand.vmem [shape: bf16[3,128], index: 4, kind: input, shape index: {}]   ;;  %s1558_s5 = inlined_call_operand.vmem [shape: f32[1,128], index: 5, kind: input, shape index: {}]   ;;  %s1559_s6 = inlined_call_operand.vmem [shape: bf16[128,128], index: 6, kind: input, shape index: {}]   ;;  %s1560_s7 = inlined_call_operand.vmem [shape: f32[1,128], index: 7, kind: input, shape index: {}]   ;;  %s1561_s8 = inlined_call_operand.vmem [shape: bf16[128,128], index: 8, kind: input, shape index: {}]   ;;  %s1562_s9 = inlined_call_operand.vmem [shape: f32[1,128], index: 9, kind: input, shape index: {}]   ;;  %s1563_s10 = inlined_call_operand.vmem [shape: f32[1,128], index: 10, kind: input, shape index: {}]   ;;  %s1564_s11 = inlined_call_operand.vmem [shape: f32[1,128], index: 11, kind: input, shape index: {}]   ;;  %s1565_s12 = inlined_call_operand.hbm [shape: f32[2,1,128], index: 12, kind: output, shape index: {}]  }
   0x1   :  { %1569 = sst [smem:[#allocation13_spill]] %s1556_s3  ;;  %s17_s23 = sshll.u32 %s1553_s0, 4  ;;  %s18_s23 = int_to_ptr.vmem [resolvable:$true] %s17_s23 }
   0x2   :  { %1570 = sst [smem:[#allocation14_spill]] %s1557_s4  ;;  %s1147_s24 = scalar_lea.vmem %s18_s23, 16 }
   0x3   :  { %p1148_p0 = scmp.ne.s32.totalorder %s18_s23, %s1147_s24  ;;  %p1152_p1 = scmp.lt.s32.totalorder %s18_s23, %s18_s23 }
   0x4   :  { %p1153_p2 = scmp.lt.s32.totalorder %s1147_s24, %s1147_s24 }
   0x6   :  { %p1154_p3 = por %p1153_p2, %p1152_p1 }
   0x8   :  { %p1155_p4 = pnand %p1154_p3, %p1148_p0 }
   0xa   :  { %1158 = shalt.err (!%p1155_p4)  }
   0xb   :  { %s1255_s25 = smov [#allocation3]  }
   0xc   :  { %20 = dma.vmem_to_smem %s18_s23, 16, %s1255_s25, [#allocation2] }
   0xd   :  { %1217 = dma.done.wait [#allocation2], 16 }
   0xe   :  { %1218 = vsyncadd [#allocation2], 4294967280 }
   0xf   :  { %22 = sfence }
  0x10   :  { %23 = vsyncpa [#allocation5], 0 }
  0x11   :  { %25 = vsyncpa [#allocation5 + $0x1], 0  ;;  %s1328_s26 = smov 0   ;;  %s1330_s27 = smov 0  }
  0x12   :  { %s1332_s0 = smov 0   ;;  %s1334_s28 = smov 0  }
  0x13   :  { %s1336_s29 = smov 0   ;;  %s1338_s30 = smov 0  }
  0x14   :  { %s1340_s13 = smov 0   ;;  %s1342_s14 = smov 0  }
  0x15 LB: > { %1571 = sst [smem:[#allocation8_spill]] %s1245_s30  ;;  %s943_s15 = sadd.s32 4294967295, %s1253_s14   ;;  %s1253_s14 = sphi %s1342_s14, %s31_s14   ;;  %s1249_s13 = sphi %s1340_s13, %s1586_s13   ;;  %s1245_s30 = sphi %s1338_s30, %s1585_s30   ;;  %s1241_s29 = sphi %s1336_s29, %s1584_s29   ;;  %s1237_s28 = sphi %s1334_s28, %s1583_s28   ;;  %s1233_s0 = sphi %s1332_s0, %s1589_s0   ;;  %s1229_s27 = sphi %s1330_s27, %s1588_s27   ;;  %s1225_s26 = sphi %s1328_s26, %s1587_s26  }
  0x16   : > { %1572 = sst [smem:[#allocation9_spill]] %s1249_s13  ;;  %s944_s16 = sadd.s32 4294967294, %s1253_s14  }
  0x17   : > { %s40_s17 = sadd.s32 1, %s1245_s30  ;;  %s43_s18 = sadd.s32 1, %s1249_s13 }
  0x18   : > { %p41_p5 = scmp.ge.s32.totalorder %s40_s17, 2  ;;  %p309_p6 = scmp.ne.s32.totalorder %s1233_s0, %s1229_s27 }
  0x19   : > { %p310_p7 = scmp.eq.s32.totalorder %s943_s15, 3  ;;  %p315_p9 = scmp.ne.s32.totalorder %s1229_s27, %s1225_s26 }
  0x1a   : > { %s1591_s17 = smov (%p41_p5, %s40_s17), 0  ;;  %s1593_s18 = smov (!%p41_p5, %s43_s18), %s1249_s13 }
  0x1b   : > { %1573 = sst [smem:[#allocation10_spill]] %s1591_s17  ;;  %p1377_p8 = por %p310_p7, %p309_p6 }
  0x1c   : > { %p45_p10 = scmp.ge.s32.totalorder %s1593_s18, 2  ;;  %p316_p11 = scmp.eq.s32.totalorder %s944_s16, 3 }
  0x1d   : > { %p947_p12 = scmp.ge.s32.totalorder %s1253_s14, 1  ;;  %p387_p13 = scmp.lt.s32.totalorder %s1253_s14, 5 }
  0x1e   : > { %s1595_s18 = smov (%p45_p10, %s1593_s18), 0  ;;  %p1387_p0 = por %p316_p11, %p315_p9 }
  0x1f   : > { %1575 = sst [smem:[#allocation11_spill]] %s1595_s18  ;;  %p388_p1 = pnand %p947_p12, %p387_p13 }
  0x20   : > { %s296_s21 = ssub.s32 %s1249_s13, %s1595_s18  ;;  %s299_s22 = sadd.s32 1, %s1233_s0 }
  0x21   : > { %p297_p2 = scmp.eq.s32.totalorder %s296_s21, 0  ;;  %391 = sbr.rel (%p388_p1) target bundleno = 718 (0x2ce), region = 64 }
  0x22   : > { %s1578_s4 = sld [smem:[#allocation14_spill]] (!%p388_p1)  ;;  %p976_p5 = scmp.ne.s32.totalorder (!%p388_p1), %s1237_s28, 0 }
  0x23   : > { %s1395_s23 = scalar_select %p297_p2, %s1233_s0, %s299_s22  }
  0x24   : > { %s1579_s3 = sld [smem:[#allocation13_spill]] (!%p388_p1) }
  0x25   : > { %1577 = sst [smem:[#allocation12_spill]] %s1395_s23 }
  0x26   : > { %vm469_vm0 = vcmask 1040384   ;;  %vm470_vm1 = vcmask 1041408   ;;  %v1256_v1 = vmov 0.0   ;;  %v1257_v2 = vmov 65535   ;;  %s445_s22 = sld [smem:[#allocation3 + %s1241_s29]]  ;;  %v1131_v10 = vld [vmem:[%s1559_s6 + $0x38] sm:$0xff]  }
  0x27   : > { %1003 = vmatprep.subr.bf16.mxu0 %v1256_v1  ;;  %1009 = vmatprep.subr.bf16.mxu1 %v1256_v1  ;;  %v471_v3 = vsel %vm469_vm0, 4294967295, %v1257_v2  ;;  %vm526_vm2 = vcmask 1045504   ;;  %vm527_vm3 = vcmask 1046528   ;;  %vm1258_vm4 = vmmov 0   ;;  %s435_s25 = sld [smem:[#allocation3 + %s1241_s29]]  ;;  %v1132_v17 = vld [vmem:[%s1559_s6 + $0x30] sm:$0xff]  }
  0x28   : > { %v464_v0 = vld [vmem:[%s1578_s4] sm:$0x3]  ;;  %v472_v5 = vsel %vm470_vm1, %v471_v3, 0  ;;  %v528_v6 = vsel %vm526_vm2, 4294967295, %v1257_v2  ;;  %1005 = vmatprep.mubr.msk.bf16.mxu0 %vm1258_vm4, %v1256_v1  ;;  %1011 = vmatprep.mubr.msk.bf16.mxu1 %vm1258_vm4, %v1256_v1  ;;  %vm465_vm5 = vcmask 23552   ;;  %vm522_vm6 = vcmask 105472  }
  0x29   : > { %v474_v7 = vand.u32 %v472_v5, %v464_v0  ;;  %v529_v8 = vsel %vm527_vm3, %v528_v6, 0  ;;  %v1133_v18 = vld [vmem:[%s1559_s6 + $0x28] sm:$0xff]   ;;  %v1134_v19 = vld [vmem:[%s1559_s6 + $0x20] sm:$0xff]   ;;  %v1135_v20 = vld [vmem:[%s1559_s6 + $0x18] sm:$0xff]   ;;  %s1580_s4 = sand.u32 1, %s1229_s27  }
  0x2a   : > { %v1130_v4 = vld [vmem:[%s1579_s3] sm:$0x7f]   ;;  %v1136_v21 = vld [vmem:[%s1559_s6 + $0x10] sm:$0xff]   ;;  %v1137_v22 = vld [vmem:[%s1559_s6 + $0x8] sm:$0xff]   ;;  %s434_s30 = scalar_lea.vmem [#allocation4], %s1580_s4 }
  0x2b   : > { %v531_v9 = vand.u32 %v1130_v4, %v529_v8  ;;  %1004 = vmatpush3.bf16.msra.mxu0 %v474_v7  ;;  %v1138_v23 = vld [vmem:[%s1559_s6] sm:$0xff]   ;;  %v1139_v24 = vld [vmem:[%s1561_s8 + $0x38] sm:$0xff]   ;;  %v1140_v25 = vld [vmem:[%s1561_s8 + $0x30] sm:$0xff]  }
  0x2c   : > { %1015 = vmatprep.subr.bf16.mxu0 %v1256_v1  ;;  %s446_s15 = sadd.s32 %s1237_s28, %s445_s22  ;;  %v1141_v26 = vld [vmem:[%s1561_s8 + $0x28] sm:$0xff]   ;;  %v1142_v27 = vld [vmem:[%s1561_s8 + $0x20] sm:$0xff]   ;;  %v1143_v28 = vld [vmem:[%s1561_s8 + $0x18] sm:$0xff]  }
  0x2d   : > { %1010 = vmatpush3.bf16.msra.mxu1 %v531_v9  ;;  %s950_s16 = sshll.u32 %s446_s15, 1  ;;  %s436_s21 = sadd.s32 %s1237_s28, %s435_s25  ;;  %v955_v33 = vld [vmem:[%s1558_s5] ss:$0 sm:$0xff]  ;;  %v1144_v45 = vld [vmem:[%s1561_s8 + $0x10] sm:$0xff]   ;;  %v1145_v46 = vld [vmem:[%s1561_s8 + $0x8] sm:$0xff]  }
  0x2e   : > { %1035 = vmatprep.subr.bf16.mxu1 %v1256_v1  ;;  %p448_p3 = scmp.lt.s32.totalorder %s950_s16, 7  ;;  %s948_s24 = sshll.u32 %s436_s21, 1  ;;  %v1146_v47 = vld [vmem:[%s1561_s8] sm:$0xff]  }
  0x2f   : > { %p438_p4 = scmp.lt.s32.totalorder %s948_s24, 7  ;;  %v956_v48 = vld [vmem:[%s1560_s7] ss:$0 sm:$0xff] }
  0x30   : > { %s1597_s16 = smov (!%p448_p3, %s950_s16), 7  ;;  %v965_v58 = vld [vmem:[%s1562_s9] ss:$0 sm:$0xff] }
  0x31   : > { %s1599_s24 = smov (!%p438_p4, %s948_s24), 7  ;;  %s951_s3 = sshll.u32 %s1597_s16, 3  ;;  %v974_v63 = vld [vmem:[%s1563_s10] ss:$0 sm:$0xff] }
  0x32   : > { %s451_s17 = scalar_lea.vmem %s1555_s2, %s951_s3  ;;  %s949_s13 = sshll.u32 %s1599_s24, 3  ;;  %v975_v5 = vld [vmem:[%s1564_s11] ss:$0 sm:$0xff] }
  0x33   : > { %v459_v11 = vld [vmem:[%s451_s17] sm:$0xff]  ;;  %v460_v12 = vld [vmem:[%s451_s17 + $0x8] sm:$0xff]  ;;  %s441_s15 = scalar_lea.vmem %s1554_s1, %s949_s13 }
  0x34   : > { %v461_v13 = vpack.c.bf16 %v460_v12, %v459_v11  ;;  %v456_v14 = vld [vmem:[%s441_s15] sm:$0xff]  ;;  %v457_v15 = vld [vmem:[%s441_s15 + $0x8] sm:$0xff] }
  0x35   : > { %v458_v16 = vpack.c.bf16 %v457_v15, %v456_v14 }
  0x36   : > { %1006 = vmatmul.mubr.msk.bf16.vlgmr.msra.gmra.mxu0 %vm465_vm5, %v461_v13 }
  0x37   : > { %1012 = vmatmul.mubr.msk.bf16.vlgmr.msra.gmra.mxu1 %vm522_vm6, %v458_v16  ;;  %1016 = vmatpush3.bf16.msra.mxu0 %v1131_v10 }
  0x38   : > { %1017 = vmatprep.subr.bf16.mxu0 %v1256_v1  ;;  %1031 = vmatprep.mubr.msk.bf16.mxu0 %vm1258_vm4, %v1256_v1 }
  0x39   : > { %1051 = vmatprep.mubr.msk.bf16.mxu1 %vm1258_vm4, %v1256_v1  ;;  %1036 = vmatpush3.bf16.msra.mxu1 %v1139_v24 }
  0x3a   : > { %1037 = vmatprep.subr.bf16.mxu1 %v1256_v1 }
  0x3b   : > { %1018 = vmatpush3.bf16.msra.mxu0 %v1132_v17 }
  0x3c   : > { %1019 = vmatprep.subr.bf16.mxu0 %v1256_v1 }
  0x3d   : > { %1038 = vmatpush3.bf16.msra.mxu1 %v1140_v25 }
  0x3e   : > { %1039 = vmatprep.subr.bf16.mxu1 %v1256_v1 }
  0x3f   : > { %1020 = vmatpush3.bf16.msra.mxu0 %v1133_v18 }
  0x40   : > { %1021 = vmatprep.subr.bf16.mxu0 %v1256_v1 }
  0x41   : > { %1040 = vmatpush3.bf16.msra.mxu1 %v1141_v26 }
  0x42   : > { %1041 = vmatprep.subr.bf16.mxu1 %v1256_v1 }
  0x43   : > { %1022 = vmatpush3.bf16.msra.mxu0 %v1134_v19 }
  0x44   : > { %1023 = vmatprep.subr.bf16.mxu0 %v1256_v1 }
  0x45   : > { %1042 = vmatpush3.bf16.msra.mxu1 %v1142_v27 }
  0x46   : > { %1043 = vmatprep.subr.bf16.mxu1 %v1256_v1 }
  0x47   : > { %1024 = vmatpush3.bf16.msra.mxu0 %v1135_v20 }
  0x48   : > { %1025 = vmatprep.subr.bf16.mxu0 %v1256_v1 }
  0x49   : > { %1044 = vmatpush3.bf16.msra.mxu1 %v1143_v28 }
  0x4a   : > { %1045 = vmatprep.subr.bf16.mxu1 %v1256_v1 }
  0x4b   : > { %1026 = vmatpush3.bf16.msra.mxu0 %v1136_v21 }
  0x4c   : > { %1027 = vmatprep.subr.bf16.mxu0 %v1256_v1 }
  0x4d   : > { %1046 = vmatpush3.bf16.msra.mxu1 %v1144_v45 }
  0x4e   : > { %1047 = vmatprep.subr.bf16.mxu1 %v1256_v1 }
  0x4f   : > { %1028 = vmatpush3.bf16.msra.mxu0 %v1137_v22 }
  0x50   : > { %1029 = vmatprep.subr.bf16.mxu0 %v1256_v1 }
  0x51   : > { %1048 = vmatpush3.bf16.msra.mxu1 %v1145_v46 }
  0x52   : > { %1049 = vmatprep.subr.bf16.mxu1 %v1256_v1 }
  0x53   : > { %1030 = vmatpush3.bf16.msra.mxu0 %v1138_v23 }
  0x55   : > { %1050 = vmatpush3.bf16.msra.mxu1 %v1146_v47 }
  0xf6   : > { %v510_v29 = vpop.f32.mrf.mxu0 }
  0xf7   : > { %v567_v30 = vpop.f32.mrf.mxu1 }
  0xf8   : > { %v568_v31 = vadd.f32 %v567_v30, %v510_v29  ;;  %v1007_v32 = vpop.f32.mrf.mxu0 }
  0xf9   : > { %v1013_v34 = vpop.f32.mrf.mxu1 }
  0xfa   : > { %v513_v35 = vpop.f32.mrf.mxu0  ;;  %v581_v37 = vadd.f32 %v955_v33, %v568_v31 }
  0xfb   : > { %v570_v36 = vpop.f32.mrf.mxu1 }
  0xfc   : > { %v571_v38 = vadd.f32 %v570_v36, %v513_v35  ;;  %v1008_v39 = vpop.f32.mrf.mxu0  ;;  %v583_v42 = vmax.f32 %v581_v37, 0.0 }
  0xfd   : > { %v1014_v40 = vpop.f32.mrf.mxu1 }
  0xfe   : > { %v582_v41 = vadd.f32 %v955_v33, %v571_v38 }
 0x100   : > { %v584_v43 = vmax.f32 %v582_v41, 0.0 }
 0x102   : > { %v585_v44 = vpack.c.bf16 %v584_v43, %v583_v42 }
 0x104   : > { %1032 = vmatmul.mubr.bf16.vlgmr.msra.gmra.mxu0 %v585_v44 }
 0x1c4   : > { %v691_v49 = vpop.f32.mrf.mxu0 }
 0x1c5   : > { %v692_v51 = vadd.f32 %v956_v48, %v691_v49 }
 0x1c6   : > { %v1033_v50 = vpop.f32.mrf.mxu0 }
 0x1c7   : > { %v698_v55 = vmax.f32 %v692_v51, 0.0 }
 0x1c8   : > { %v694_v52 = vpop.f32.mrf.mxu0 }
 0x1c9   : > { %v695_v53 = vadd.f32 %v956_v48, %v694_v52 }
 0x1ca   : > { %v1034_v54 = vpop.f32.mrf.mxu0 }
 0x1cb   : > { %v699_v56 = vmax.f32 %v695_v53, 0.0 }
 0x1cd   : > { %v700_v57 = vpack.c.bf16 %v699_v56, %v698_v55 }
 0x1cf   : > { %1052 = vmatmul.mubr.bf16.vlgmr.msra.gmra.mxu1 %v700_v57 }
 0x28f   : > { %v806_v59 = vpop.f32.mrf.mxu1 }
 0x290   : > { %v807_v60 = vadd.f32 %v965_v58, %v806_v59 }
 0x291   : > { %v1053_v61 = vpop.f32.mrf.mxu1 }
 0x292   : > { %v813_v62 = vmax.f32 %v807_v60, 0.0 }
 0x293   : > { %v809_v0 = vpop.f32.mrf.mxu1 }
 0x294   : > { %v810_v1 = vadd.f32 %v965_v58, %v809_v0  ;;  %v822_v3 = vmul.f32 %v974_v63, %v813_v62 }
 0x295   : > { %v1054_v2 = vpop.f32.mrf.mxu1 }
 0x296   : > { %v814_v4 = vmax.f32 %v810_v1, 0.0  ;;  %v831_v7 = vadd.f32 %v975_v5, %v822_v3 }
 0x298   : > { %v823_v6 = vmul.f32 %v974_v63, %v814_v4 }
 0x29a   : > { %v832_v8 = vadd.f32 %v975_v5, %v823_v6 }
 0x29c   : > { %v833_v9 = vmax.f32 %v831_v7, %v832_v8 }
 0x29e   : > { %v834_v10 = vrot.slane %v833_v9, 4 }
 0x2a0   : > { %v835_v11 = vmax.f32 %v833_v9, %v834_v10 }
 0x2a2   : > { %v836_v12 = vrot.slane %v835_v11, 2 }
 0x2a4   : > { %v837_v13 = vmax.f32 %v835_v11, %v836_v12  ;;  %843 = sbr.rel (%p976_p5) target bundleno = 683 (0x2ab), region = 68 }
 0x2a6   : > { %v838_v14 = vrot.slane %v837_v13, 1 }
 0x2a8   : > { %v839_v15 = vmax.f32 %v837_v13, %v838_v14 }
 0x2aa   : > { %844 = vst [vmem:[%s434_s30] sm:$0x1] %v839_v15 }
 0x2ab PF: > { %p977_p6 = scmp.eq.s32.totalorder %s1237_s28, 0 }
 0x2ad   : > { %848 = sbr.rel (%p977_p6) target bundleno = 694 (0x2b6), region = 72 }
 0x2b2   : > { %v849_v16 = vld [vmem:[%s434_s30] sm:$0x1] }
 0x2b3   : > { %v850_v17 = vmax.f32 %v849_v16, %v839_v15 }
 0x2b5   : > { %851 = vst [vmem:[%s434_s30] sm:$0x1] %v850_v17 }
 0x2b6 PF: > { %s978_s13 = sshll.u32 %s1241_s29, 4  ;;  %s865_s24 = sshll.u32 %s434_s30, 4  ;;  %s866_s24 = int_to_ptr.vmem [resolvable:$true] %s865_s24 }
 0x2b7   : > { %s863_s23 = scalar_lea.hbm %s1565_s12, %s978_s13  ;;  %s1581_s16 = sand.u32 1, %s1229_s27  }
 0x2b8   : > { %s853_s21 = scalar_lea.sflag [#allocation5], %s1581_s16  ;;  %s1159_s22 = scalar_lea.vmem %s866_s24, 16 }
 0x2b9   : > { %p1160_p7 = scmp.ne.s32.totalorder %s866_s24, %s1159_s22  ;;  %s1259_s28 = smov [#allocation4]  }
 0x2ba   : > { %s1163_s25 = sshll.u32 %s1259_s28, 4  ;;  %s1164_s25 = int_to_ptr.vmem [resolvable:$false] %s1163_s25 }
 0x2bb   : > { %p1161_p9 = pnand %p1160_p7, %p1377_p8  ;;  %s1165_s15 = scalar_lea.vmem %s1164_s25, 32 }
 0x2bc   : > { %p1166_p11 = scmp.lt.s32.totalorder %s866_s24, %s1164_s25  ;;  %p1167_p12 = scmp.lt.s32.totalorder %s1165_s15, %s1159_s22 }
 0x2bd   : > { %p1162_p10 = pneg %p1161_p9 }
 0x2be   : > { %p1168_p13 = por %p1167_p12, %p1166_p11 }
 0x2c0   : > { %p1169_p1 = pnand %p1168_p13, %p1162_p10 }
 0x2c2   : > { %1172 = shalt.err (!%p1169_p1)
}
 0x2c3   : > { %s1173_s29 = scalar_lea.hbm %s863_s23, 16  ;;  %s1177_s30 = scalar_lea.hbm %s1565_s12, 32 }
 0x2c4   : > { %p1174_p2 = scmp.ne.s32.totalorder %s863_s23, %s1173_s29  ;;  %p1178_p5 = scmp.lt.s32.totalorder %s863_s23, %s1565_s12 }
 0x2c5   : > { %p1179_p6 = scmp.lt.s32.totalorder %s1177_s30, %s1173_s29 }
 0x2c6   : > { %p1175_p3 = pnand %p1174_p2, %p1377_p8 }
 0x2c7   : > { %p1180_p7 = por %p1179_p6, %p1178_p5 }
 0x2c8   : > { %p1176_p4 = pneg %p1175_p3 }
 0x2ca   : > { %p1181_p9 = pnand %p1180_p7, %p1176_p4 }
 0x2cc   : > { %1184 = shalt.err (!%p1181_p9)
}
 0x2cd   : > { %1055 = dma.vmem_to_hbm [thread:$0]  (%p1377_p8), %s866_s24, 16, %s863_s23, %s853_s21  }
 0x2ce PF: > { %p1061_p10 = scmp.ge.s32.totalorder %s1253_s14, 2  ;;  %s877_s18 = sand.u32 1, %s1225_s26  }
 0x2cf   : > { %s878_s16 = scalar_lea.sflag [#allocation5], %s877_s18 }
 0x2d0   : > { %p1058_p11 = pnand %p1061_p10, %p1387_p0 }
 0x2d2   : > { %p1059_p12 = pneg %p1058_p11 }
 0x2d4   : > { %1220 = dma.done.wait (%p1059_p12), %s878_s16, 16  }
 0x2d5   : > { %1222 = vsyncadd (%p1059_p12), %s878_s16, 4294967280  ;;  %s31_s14 = sadd.s32 1, %s1253_s14   ;;  %s1582_s22 = sld [smem:[#allocation12_spill]] }
 0x2d6   : > { %p28_p13 = scmp.ge.s32.totalorder %s31_s14, 6   ;;  %s1583_s28 = sld [smem:[#allocation8_spill]] }
 0x2d7   : > { %s1584_s29 = sld [smem:[#allocation9_spill]]  ;;  %s1587_s26 = smov %s1229_s27 }
 0x2d8   : > { %s1585_s30 = sld [smem:[#allocation10_spill]]  ;;  %s1588_s27 = smov %s1233_s0 }
 0x2d9   : > { %s1586_s13 = sld [smem:[#allocation11_spill]]  ;;  %30 = sbr.rel (!%p28_p13) target bundleno = 21 (0x15), region = 110 }
 0x2db   : > { %s1589_s0 = smov %s1582_s22 }
 0x2de   :  { %882 = vsyncpa [#allocation5], 1 }
 0x2df   :  { %884 = vsyncpa [#allocation5 + $0x1], 1 }

</bundles_post_ra>
